<compile_context>
chip_gen: v6e
topology: v6e:2x2x1
jax: 0.10.0
libtpu: 0.0.40
codegen_flags: <defaults>
</compile_context>

<pallas_src>
import functools

import jax
import jax.numpy as jnp
from jax.experimental import pallas as pl
from jax.experimental.pallas import tpu as pltpu

HIDDEN = 50     # nn.Linear(input_size, 50)
HP = 64         # per-reward hidden block, padded 50 -> 64 (keeps R*HP lane-dense)
OUT = 128       # padded head-output lane width (one full vreg)


def _hybrid_ac_kernel(x_ref, p_ref, out_ref, *, A, D, HPAD):
    """Single-step kernel: everything resident in VMEM, two MXU matmuls, one softmax."""
    x = x_ref[...]                                                      # (1, D)

    # Packed state layer: (1, D) @ (D, R*HP) + bias, ReLU.  Pad columns are zero.
    ws = p_ref[HPAD + 8:HPAD + 8 + D, :]                                # (D, HPAD)
    bs = p_ref[HPAD:HPAD + 1, :]                                        # (1, HPAD)
    h = jnp.maximum(
        jnp.dot(x, ws, preferred_element_type=jnp.float32) + bs, 0.0)  # (1, HPAD)

    # Packed heads: block-diagonal [actor | critic] blocks per reward type, plus A
    # "summed actor" columns at lane offset 0 so the MXU emits the overall logits.
    wh = p_ref[0:HPAD, 0:OUT]                                           # (HPAD, OUT)
    bh = p_ref[HPAD + 1:HPAD + 2, 0:OUT]                                # (1, OUT)
    y = jnp.dot(h, wh, preferred_element_type=jnp.float32) + bh         # (1, OUT)

    # Masked softmax over the first A lanes (exact division; masked lanes -> prob 0).
    lane = jax.lax.broadcasted_iota(jnp.int32, (1, OUT), 1)
    logits = jnp.where(lane < A, y, -jnp.inf)
    m = jnp.max(logits, axis=-1, keepdims=True)
    e = jnp.exp(logits - m)
    prob = e / jnp.sum(e, axis=-1, keepdims=True)                       # (1, OUT)

    # Single lane-dense output slab: [ head values (OUT lanes) | probs (OUT lanes) ].
    out_ref[:, 0:OUT] = y
    out_ref[:, OUT:2 * OUT] = prob


def pack_params(w_state, b_state, w_actor, b_actor, w_critic, b_critic):
    """Pack all parameters into ONE lane-aligned f32 slab.  Call once at init /
    weight-update time; it is intentionally NOT part of the jitted forward."""
    R, D, H = w_state.shape
    A = w_actor.shape[-1]
    HPAD = R * HP
    assert H <= HP, "hidden size must fit the padded per-reward block"
    assert A + R * (A + 1) <= OUT, "head columns must fit one vreg"
    assert HPAD >= OUT, "this packing assumes reward_types * 64 >= 128"

    ws = jnp.zeros((D, HPAD), jnp.float32)
    bs = jnp.zeros((HPAD,), jnp.float32)
    wh = jnp.zeros((HPAD, OUT), jnp.float32)
    bh = jnp.zeros((OUT,), jnp.float32)
    for r in range(R):
        r0 = r * HP
        ws = ws.at[:, r0:r0 + H].set(w_state[r])
        bs = bs.at[r0:r0 + H].set(b_state[r, 0])
        # Summed-actor columns (overall_action_* frozen to weight=1, bias=0 ->
        # overall logits = sum_r (h_r @ Wactor_r + bactor_r)).
        wh = wh.at[r0:r0 + H, 0:A].set(w_actor[r])
        bh = bh.at[0:A].add(b_actor[r, 0])
        # Per-reward-type [policy | critic] block (block-diagonal over r).
        c0 = A + r * (A + 1)
        wh = wh.at[r0:r0 + H, c0:c0 + A].set(w_actor[r])
        wh = wh.at[r0:r0 + H, c0 + A:c0 + A + 1].set(w_critic[r])
        bh = bh.at[c0:c0 + A].set(b_actor[r, 0])
        bh = bh.at[c0 + A].set(b_critic[r, 0, 0])

    # Slab layout (width = HPAD lanes):
    #   rows [0 : HPAD]            head weights   (cols [0:OUT])
    #   row  HPAD                  state bias     (HPAD lanes)
    #   row  HPAD+1                head bias      (cols [0:OUT])
    #   rows [HPAD+8 : HPAD+8+D]   state weights  (8-row gap keeps sublane alignment)
    slab = jnp.zeros((HPAD + 8 + D, HPAD), jnp.float32)
    slab = slab.at[0:HPAD, 0:OUT].set(wh)
    slab = slab.at[HPAD, :].set(bs)
    slab = slab.at[HPAD + 1, 0:OUT].set(bh)
    slab = slab.at[HPAD + 8:HPAD + 8 + D, :].set(ws)
    return jax.device_put(slab)


@functools.partial(jax.jit, static_argnames=("actions", "reward_types"))
def hybrid_actor_critic_forward(x, params, *, actions, reward_types):
    """x: (1, D) f32; params: slab from pack_params().  Returns (prob, comb_policies,
    comb_critic) matching the PyTorch forward shapes ((A,), (R,1,A), (R,1,1))."""
    R, A = reward_types, actions
    D = x.shape[1]
    HPAD = R * HP
    assert params.shape == (HPAD + 8 + D, HPAD)

    vmem = pl.BlockSpec(memory_space=pltpu.MemorySpace.VMEM)
    kernel = functools.partial(_hybrid_ac_kernel, A=A, D=D, HPAD=HPAD)
    cost = pl.CostEstimate(
        flops=2 * (D * HPAD + HPAD * OUT),
        transcendentals=OUT,
        bytes_accessed=4 * (params.size + x.size + 2 * OUT),
    )

    out = pl.pallas_call(
        kernel,
        out_shape=jax.ShapeDtypeStruct((1, 2 * OUT), jnp.float32),
        in_specs=[vmem, vmem],
        out_specs=vmem,
        cost_estimate=cost,
    )(x, params)

    # Tiny post-kernel unpacking (output side only; all weight packing is pre-done).
    head = out[0, :OUT]
    blocks = head[A:A + R * (A + 1)].reshape(R, 1, A + 1)
    comb_policies = blocks[..., :A]                 # (R, 1, A)
    comb_critic = blocks[..., A:]                   # (R, 1, 1)
    prob = out[0, OUT:OUT + A]                      # (A,)  softmax over actions
    return prob, comb_policies, comb_critic


def init_params(key, input_size, actions, reward_types):
    """Deterministic parameter construction mirroring HybridActorCriticNet.__init__.
    Weights stored input-major: W[r] == pytorch_weight.T."""
    D, A, R, H = input_size, actions, reward_types, HIDDEN
    k_ws, k_bs, k_wa = jax.random.split(key, 3)

    # state_i layers: generic random init (weights_init) — fan-in scaled normal.
    w_state = jax.random.normal(k_ws, (R, D, H), jnp.float32) * (1.0 / jnp.sqrt(D))
    b_state = jax.random.normal(k_bs, (R, 1, H), jnp.float32) * 0.01

    # actor_i: bias=0, weight = normalized_columns_initializer(std=0.01).
    raw = jax.random.normal(k_wa, (R, H, A), jnp.float32)
    col_norm = jnp.sqrt(jnp.sum(raw * raw, axis=1, keepdims=True))      # (R, 1, A)
    w_actor = raw * (0.01 / col_norm)
    b_actor = jnp.zeros((R, 1, A), jnp.float32)

    # critic_i: weight=0, bias=0.
    w_critic = jnp.zeros((R, H, 1), jnp.float32)
    b_critic = jnp.zeros((R, 1, 1), jnp.float32)

    return w_state, b_state, w_actor, b_actor, w_critic, b_critic


def reference_forward(x, w_state, b_state, w_actor, b_actor, w_critic, b_critic):
    """Pure-JAX reference of the PyTorch forward for verification."""
    h = jnp.maximum(jnp.einsum("bd,rdh->rbh", x, w_state) + b_state, 0.0)   # (R,1,H)
    pol = jnp.einsum("rbh,rha->rba", h, w_actor) + b_actor                  # (R,1,A)
    crit = jnp.einsum("rbh,rhk->rbk", h, w_critic) + b_critic               # (R,1,1)
    logits = jnp.sum(pol[:, 0, :], axis=0)                                  # (A,)
    prob = jax.nn.softmax(logits, axis=0)
    return prob, pol, crit


if __name__ == "__main__":
    input_size = 32
    actions = 8
    reward_types = 4

    key = jax.random.PRNGKey(0)
    k_params, k_x = jax.random.split(key)
    raw_params = init_params(k_params, input_size, actions, reward_types)

    # One-time packing (hoisted out of the per-call forward path).
    params = pack_params(*raw_params)

    # Forward requires batch=1 (torch code resizes per-action input to (1, reward_types)).
    x = jax.random.normal(k_x, (1, input_size), jnp.float32)

    prob, comb_policies, comb_critic = hybrid_actor_critic_forward(
        x, params, actions=actions, reward_types=reward_types)
    jax.block_until_ready((prob, comb_policies, comb_critic))

    # Sanity-check against pure-JAX reference.
    prob_r, pol_r, crit_r = reference_forward(x, *raw_params)
    assert prob.shape == (actions,)
    assert comb_policies.shape == (reward_types, 1, actions)
    assert comb_critic.shape == (reward_types, 1, 1)
    assert jnp.allclose(jnp.sum(prob), 1.0, atol=1e-5)
    assert jnp.allclose(prob, prob_r, rtol=1e-4, atol=1e-5)
    assert jnp.allclose(comb_policies, pol_r, rtol=1e-4, atol=1e-5)
    assert jnp.allclose(comb_critic, crit_r, rtol=1e-4, atol=1e-5)

    print("KERNEL_OK")
</pallas_src>

<mosaic_0001>
module attributes {stable_mosaic.version = 11 : i64} {
  func.func @_hybrid_ac_kernel(%arg0: memref<1x32xf32, #tpu.memory_space<vmem>>, %arg1: memref<296x256xf32, #tpu.memory_space<vmem>>, %arg2: memref<1x256xf32, #tpu.memory_space<vmem>>) attributes {dimension_semantics = [], scalar_prefetch = 0 : i64, scratch_operands = 0 : i64, tpu.core_type = #tpu.core_type<tc>} {
    %c0 = arith.constant 0 : index
    %c0_0 = arith.constant 0 : index
    %0 = vector.load %arg0[%c0, %c0_0] : memref<1x32xf32, #tpu.memory_space<vmem>>, vector<1x32xf32>
    %c264 = arith.constant 264 : index
    %c0_1 = arith.constant 0 : index
    %1 = vector.load %arg1[%c264, %c0_1] : memref<296x256xf32, #tpu.memory_space<vmem>>, vector<32x256xf32>
    %c256 = arith.constant 256 : index
    %c0_2 = arith.constant 0 : index
    %2 = vector.load %arg1[%c256, %c0_2] : memref<296x256xf32, #tpu.memory_space<vmem>>, vector<1x256xf32>
    %cst = arith.constant dense<0.000000e+00> : vector<1x256xf32>
    %3 = tpu.matmul %0, %1, %cst {dimension_numbers = #tpu.dot_dimension_numbers<[1], [0], [0], [1], [0, 0, 1, 1], [], []>} : vector<1x32xf32>, vector<32x256xf32>, vector<1x256xf32> -> vector<1x256xf32>
    %4 = arith.addf %3, %2 : vector<1x256xf32>
    %cst_3 = arith.constant 0.000000e+00 : f32
    %5 = vector.broadcast %cst_3 : f32 to vector<1x256xf32>
    %6 = arith.maximumf %4, %5 : vector<1x256xf32>
    %c0_4 = arith.constant 0 : index
    %c0_5 = arith.constant 0 : index
    %7 = vector.load %arg1[%c0_4, %c0_5] : memref<296x256xf32, #tpu.memory_space<vmem>>, vector<256x128xf32>
    %c257 = arith.constant 257 : index
    %c0_6 = arith.constant 0 : index
    %8 = vector.load %arg1[%c257, %c0_6] : memref<296x256xf32, #tpu.memory_space<vmem>>, vector<1x128xf32>
    %cst_7 = arith.constant dense<0.000000e+00> : vector<1x128xf32>
    %9 = tpu.matmul %6, %7, %cst_7 {dimension_numbers = #tpu.dot_dimension_numbers<[1], [0], [0], [1], [0, 0, 1, 1], [], []>} : vector<1x256xf32>, vector<256x128xf32>, vector<1x128xf32> -> vector<1x128xf32>
    %10 = arith.addf %9, %8 : vector<1x128xf32>
    %11 = tpu.iota {dimensions = array<i32: 1>} : vector<1x128xi32>
    %c8_i32 = arith.constant 8 : i32
    %12 = vector.broadcast %c8_i32 : i32 to vector<1x128xi32>
    %13 = arith.cmpi slt, %11, %12 : vector<1x128xi32>
    %cst_8 = arith.constant 0xFF800000 : f32
    %14 = vector.broadcast %cst_8 : f32 to vector<1x128xf32>
    %15 = arith.select %13, %10, %14 : vector<1x128xi1>, vector<1x128xf32>
    %cst_9 = arith.constant dense<0xFF800000> : vector<1xf32>
    %16 = vector.multi_reduction <maximumf>, %15, %cst_9 [1] : vector<1x128xf32> to vector<1xf32>
    %17 = vector.shape_cast %16 : vector<1xf32> to vector<1x1xf32>
    %18 = vector.broadcast %17 : vector<1x1xf32> to vector<1x128xf32>
    %19 = arith.subf %15, %18 : vector<1x128xf32>
    %20 = math.exp %19 : vector<1x128xf32>
    %cst_10 = arith.constant dense<0.000000e+00> : vector<1xf32>
    %21 = vector.multi_reduction <add>, %20, %cst_10 [1] : vector<1x128xf32> to vector<1xf32>
    %22 = vector.shape_cast %21 : vector<1xf32> to vector<1x1xf32>
    %23 = vector.broadcast %22 : vector<1x1xf32> to vector<1x128xf32>
    %24 = arith.divf %20, %23 : vector<1x128xf32>
    %c0_11 = arith.constant 0 : index
    %c0_12 = arith.constant 0 : index
    %25 = vector.load %arg2[%c0_11, %c0_12] : memref<1x256xf32, #tpu.memory_space<vmem>>, vector<1x128xf32>
    tpu.vector_store %arg2[%c0_11, %c0_12], %10 {strides = array<i32>} : memref<1x256xf32, #tpu.memory_space<vmem>>, vector<1x128xf32>,
    %c0_13 = arith.constant 0 : index
    %c128 = arith.constant 128 : index
    %26 = vector.load %arg2[%c0_13, %c128] : memref<1x256xf32, #tpu.memory_space<vmem>>, vector<1x128xf32>
    tpu.vector_store %arg2[%c0_13, %c128], %24 {strides = array<i32>} : memref<1x256xf32, #tpu.memory_space<vmem>>, vector<1x128xf32>,
    return
  }
}

</mosaic_0001>

<bundles_post_ra>
// kernel: hybrid_actor_critic_forward.1
= control target key start
LH: loop header
LB: loop body
LE: loop exit
PB: predicated region body
PF: predicated region fallthrough
CT: control target
= control target key end

     0   :  { %7 = vsyncpa [#allocation3], 0  ;;  %s396_s0 = inlined_call_operand.hbm [shape: f32[1,32], index: 0, kind: input, shape index: {}]   ;;  %s397_s1 = inlined_call_operand.hbm [shape: f32[296,256], index: 1, kind: input, shape index: {}]   ;;  %s398_s2 = inlined_call_operand.vmem [shape: f32[1,256], index: 2, kind: output, shape index: {}]  }
   0x1   :  { %8 = vsyncpa [#allocation5], 0  ;;  %s356_s9 = smov [#allocation2]   ;;  %s357_s11 = smov [#allocation4]  }
   0x2   :  { %s15_s10 = sshll.u32 %s356_s9, 4  ;;  %s24_s12 = sshll.u32 %s357_s11, 4  ;;  %s16_s10 = int_to_ptr.vmem [resolvable:$true] %s15_s10  ;;  %s25_s12 = int_to_ptr.vmem [resolvable:$true] %s24_s12 }
   0x3   :  { %s320_s13 = scalar_lea.vmem %s16_s10, 16  ;;  %s324_s14 = scalar_lea.vmem %s16_s10, 32 }
   0x4   :  { %p321_p0 = scmp.ne.s32.totalorder %s16_s10, %s320_s13  ;;  %p325_p1 = scmp.lt.s32.totalorder %s16_s10, %s16_s10 }
   0x5   :  { %p326_p2 = scmp.lt.s32.totalorder %s324_s14, %s320_s13 }
   0x7   :  { %p327_p3 = por %p326_p2, %p325_p1 }
   0x9   :  { %p328_p4 = pnand %p327_p3, %p321_p0 }
   0xb   :  { %331 = shalt.err (!%p328_p4)
}
   0xc   :  { %18 = dma.hbm_to_vmem [thread:$0]  %s396_s0, 16, %s16_s10, [#allocation3]  }
   0xd   :  { %s340_s17 = scalar_lea.vmem %s25_s12, 9472  ;;  %p345_p6 = scmp.lt.s32.totalorder %s25_s12, %s25_s12 }
   0xe   :  { %p341_p5 = scmp.ne.s32.totalorder %s25_s12, %s340_s17  ;;  %p346_p7 = scmp.lt.s32.totalorder %s340_s17, %s340_s17 }
  0x10   :  { %p347_p8 = por %p346_p7, %p345_p6 }
  0x12   :  { %p348_p9 = pnand %p347_p8, %p341_p5 }
  0x14   :  { %351 = shalt.err (!%p348_p9)
}
  0x15   :  { %s358_s18 = smov 256   ;;  %s359_s19 = smov 16  }
  0x16   :  { %30 = dma.hbm_to_vmem [thread:$0]  %s397_s1, 9472, %s25_s12, [#allocation5], %s358_s18, %s358_s18, %s359_s19  }
  0x17   :  { %352 = dma.done.wait [#allocation3], 16  }
  0x18   :  { %353 = vsyncadd [#allocation3], 4294967280 }
  0x19   :  { %354 = dma.done.wait [#allocation5], 9472  }
  0x1a   :  { %355 = vsyncadd [#allocation5], 4294957824  ;;  %v360_v0 = vmov 0.0   ;;  %v45_v1 = vld [vmem:[#allocation4 + $0x248] sm:$0xff]  ;;  %v44_v2 = vld [vmem:[#allocation4 + $0x240] sm:$0xff]  ;;  %vm59_vm0 = vcmask 261120   ;;  %v49_v42 = vlaneseq }
  0x1b   :  { %127 = vmatprep.mubr.f32.mxu0 %v360_v0  ;;  %v43_v3 = vld [vmem:[#allocation4 + $0x238] sm:$0xff]  ;;  %87 = vmatprep.subr.mxu0 %v45_v1  ;;  %v42_v4 = vld [vmem:[#allocation4 + $0x230] sm:$0xff]  ;;  %v41_v5 = vld [vmem:[#allocation4 + $0x228] sm:$0xff]  ;;  %vm243_vm3 = vcmask 1040384  }
  0x1c   :  { %88 = vmatpush1.msra.mxu0 %v44_v2  ;;  %v40_v6 = vld [vmem:[#allocation4 + $0x220] sm:$0xff]  ;;  %v167_v7 = vld [vmem:[#allocation4 + $0x1f0] sm:$0xff]  ;;  %v39_v10 = vld [vmem:[#allocation4 + $0x218] sm:$0xff]  ;;  %v50_v43 = vshrl.u32 %v49_v42, 7  ;;  %v240_v56 = vand.u32 127, %v49_v42  ;;  %vm382_vm1 = vcmp.lt.s32.totalorder %v49_v42, 128 }
  0x1d   :  { %89 = vmatprep.subr.mxu0 %v43_v3  ;;  %v151_v8 = vld [vmem:[#allocation4 + $0xf0] sm:$0xff]  ;;  %v166_v9 = vld [vmem:[#allocation4 + $0x1e0] sm:$0xff]  ;;  %268 = vmatprep.subr.mxu1 %v167_v7  ;;  %v37_v14 = vld [vmem:[#allocation2] sm:$0x1] }
  0x1e   :  { %90 = vmatpush1.msra.mxu0 %v42_v4  ;;  %v150_v11 = vld [vmem:[#allocation4 + $0xe0] sm:$0xff]  ;;  %v38_v12 = vld [vmem:[#allocation4 + $0x210] sm:$0xff]  ;;  %269 = vmatpush3.msra.mxu1 %v151_v8  ;;  %v51_v44 = vsub.s32 0, %v50_v43  ;;  %v55_v46 = vsub.s32 1, %v50_v43  ;;  %vm241_vm2 = vcmp.lt.s32.totalorder %v240_v56, 8 }
  0x1f   :  { %91 = vmatprep.subr.mxu0 %v41_v5  ;;  %v165_v13 = vld [vmem:[#allocation4 + $0x1d0] sm:$0xff]  ;;  %270 = vmatprep.subr.mxu1 %v166_v9  ;;  %v164_v16 = vld [vmem:[#allocation4 + $0x1c0] sm:$0xff] }
  0x20   :  { %92 = vmatpush1.msra.mxu0 %v40_v6  ;;  %v149_v15 = vld [vmem:[#allocation4 + $0xd0] sm:$0xff]  ;;  %271 = vmatpush3.msra.mxu1 %v150_v11  ;;  %v148_v17 = vld [vmem:[#allocation4 + $0xc0] sm:$0xff] }
  0x21   :  { %93 = vmatprep.subr.mxu0 %v39_v10  ;;  %272 = vmatprep.subr.mxu1 %v165_v13  ;;  %v163_v18 = vld [vmem:[#allocation4 + $0x1b0] sm:$0xff]  ;;  %v162_v20 = vld [vmem:[#allocation4 + $0x1a0] sm:$0xff] }
  0x22   :  { %94 = vmatpush1.msra.mxu0 %v38_v12  ;;  %273 = vmatpush3.msra.mxu1 %v149_v15  ;;  %v147_v19 = vld [vmem:[#allocation4 + $0xb0] sm:$0xff]  ;;  %v146_v21 = vld [vmem:[#allocation4 + $0xa0] sm:$0xff] }
  0x23   :  { %267 = vmatmul.mubr.msk.f32.vlgmr.msra.gmra.mxu0 %vm59_vm0, %v37_v14  ;;  %274 = vmatprep.subr.mxu1 %v164_v16  ;;  %v161_v22 = vld [vmem:[#allocation4 + $0x190] sm:$0xff]  ;;  %v160_v24 = vld [vmem:[#allocation4 + $0x180] sm:$0xff] }
  0x24   :  { %275 = vmatpush3.msra.mxu1 %v148_v17  ;;  %v145_v23 = vld [vmem:[#allocation4 + $0x90] sm:$0xff]  ;;  %v144_v25 = vld [vmem:[#allocation4 + $0x80] sm:$0xff] }
  0x25   :  { %276 = vmatprep.subr.mxu1 %v163_v18  ;;  %v159_v26 = vld [vmem:[#allocation4 + $0x170] sm:$0xff]  ;;  %v158_v28 = vld [vmem:[#allocation4 + $0x160] sm:$0xff] }
  0x26   :  { %277 = vmatpush3.msra.mxu1 %v147_v19  ;;  %v143_v27 = vld [vmem:[#allocation4 + $0x70] sm:$0xff]  ;;  %v142_v29 = vld [vmem:[#allocation4 + $0x60] sm:$0xff] }
  0x27   :  { %278 = vmatprep.subr.mxu1 %v162_v20  ;;  %v157_v30 = vld [vmem:[#allocation4 + $0x150] sm:$0xff]  ;;  %v156_v32 = vld [vmem:[#allocation4 + $0x140] sm:$0xff] }
  0x28   :  { %279 = vmatpush3.msra.mxu1 %v146_v21  ;;  %v141_v31 = vld [vmem:[#allocation4 + $0x50] sm:$0xff]  ;;  %v140_v33 = vld [vmem:[#allocation4 + $0x40] sm:$0xff] }
  0x29   :  { %280 = vmatprep.subr.mxu1 %v161_v22  ;;  %v155_v34 = vld [vmem:[#allocation4 + $0x130] sm:$0xff]  ;;  %v154_v36 = vld [vmem:[#allocation4 + $0x120] sm:$0xff] }
  0x2a   :  { %281 = vmatpush3.msra.mxu1 %v145_v23  ;;  %v139_v35 = vld [vmem:[#allocation4 + $0x30] sm:$0xff]  ;;  %v138_v37 = vld [vmem:[#allocation4 + $0x20] sm:$0xff] }
  0x2b   :  { %282 = vmatprep.subr.mxu1 %v160_v24  ;;  %v153_v38 = vld [vmem:[#allocation4 + $0x110] sm:$0xff]  ;;  %v152_v40 = vld [vmem:[#allocation4 + $0x100] sm:$0xff] }
  0x2c   :  { %283 = vmatpush3.msra.mxu1 %v144_v25  ;;  %v137_v39 = vld [vmem:[#allocation4 + $0x10] sm:$0xff]  ;;  %v136_v41 = vld [vmem:[#allocation4] sm:$0xff] }
  0x2d   :  { %284 = vmatprep.subr.mxu1 %v159_v26  ;;  %v47_v45 = vld [vmem:[#allocation4 + $0x200] ss:$8 sm:$0x3]  ;;  %v168_v57 = vld [vmem:[#allocation4 + $0x201] ss:$0 sm:$0xff] }
  0x2e   :  { %285 = vmatpush3.msra.mxu1 %v143_v27  ;;  %v52_v47 = vrot.slane %v47_v45, %v51_v44  ;;  %v56_v48 = vrot.slane %v47_v45, %v55_v46 }
  0x2f   :  { %286 = vmatprep.subr.mxu1 %v158_v28 }
  0x30   :  { %287 = vmatpush3.msra.mxu1 %v142_v29 }
  0x31   :  { %288 = vmatprep.subr.mxu1 %v157_v30 }
  0x32   :  { %289 = vmatpush3.msra.mxu1 %v141_v31 }
  0x33   :  { %290 = vmatprep.subr.mxu1 %v156_v32 }
  0x34   :  { %291 = vmatpush3.msra.mxu1 %v140_v33 }
  0x35   :  { %292 = vmatprep.subr.mxu1 %v155_v34 }
  0x36   :  { %293 = vmatpush3.msra.mxu1 %v139_v35 }
  0x37   :  { %294 = vmatprep.subr.mxu1 %v154_v36 }
  0x38   :  { %295 = vmatpush3.msra.mxu1 %v138_v37 }
  0x39   :  { %296 = vmatprep.subr.mxu1 %v153_v38 }
  0x3a   :  { %297 = vmatpush3.msra.mxu1 %v137_v39 }
  0x3b   :  { %298 = vmatprep.subr.mxu1 %v152_v40 }
  0x3c   :  { %299 = vmatpush3.msra.mxu1 %v136_v41 }
  0xe3   :  { %v129_v49 = vpop.f32.mrf.mxu0 }
  0xe4   :  { %v130_v50 = vadd.f32 %v129_v49, %v52_v47 }
  0xe5   :  { %v131_v51 = vpop.f32.mrf.mxu0 }
  0xe6   :  { %v132_v52 = vadd.f32 %v131_v51, %v56_v48  ;;  %v134_v54 = vmax.f32 %v130_v50, 0.0 }
  0xe8   :  { %v135_v53 = vmax.f32 %v132_v52, 0.0 }
  0xea   :  { %233 = vmatprep.mubr.f32.mxu1 %v135_v53 }
  0xeb   :  { %234 = vmatmul.mubr.f32.vlgmr.msra.gmra.mxu1 %v134_v54 }
 0x1ab   :  { %v300_v55 = vpop.f32.mrf.mxu1 }
 0x1ad   :  { %v301_v58 = vpop.f32.mrf.mxu1 }
 0x1ae   :  { %v302_v59 = vadd.f32 %v301_v58, %v300_v55 }
 0x1b0   :  { %v236_v61 = vadd.f32 %v302_v59, %v168_v57 }
 0x1b2   :  { %259 = vst.msk [vmem:[%s398_s2] sm:$0x1] %vm382_vm1, %v236_v61  ;;  %v242_v62 = vsel %vm241_vm2, %v236_v61, -inf }
 0x1b3   :  { %v244_v63 = vsel %vm243_vm3, %v242_v62, -inf }
 0x1b4   :  { %245 = vmax.xlane.f32.xlu0 %v244_v63 }
 0x23d   :  { %v246_v0 = vpop.xlane.xlu0 %245 }
 0x23e   :  { %v247_v1 = vsub.f32 %v242_v62, %v246_v0 }
 0x240   :  { %v248_v2 = vmul.f32 1.442695, %v247_v1 }
 0x242   :  { %308 = vpow2.f32 %v248_v2 }
 0x24f   :  { %v309_v3 = vpop.eup %308 }
 0x250   :  { %v250_v4 = vsel %vm243_vm3, %v309_v3, 0.0 }
 0x251   :  { %251 = vadd.xlane.f32.xlu0 %v250_v4 }
 0x2da   :  { %v252_v5 = vpop.xlane.xlu0 %251 }
 0x2db   :  { %310 = vrcp.f32 %v252_v5 }
 0x2e8   :  { %v311_v6 = vpop.eup %310 }
 0x2e9   :  { %v254_v7 = vmul.f32 %v311_v6, %v309_v3 }
 0x2eb   :  { %260 = vst.msk [vmem:[%s398_s2 + $0x1] sm:$0x1] %vm382_vm1, %v254_v7 }
 0x2ec   :  { %265 = vsyncpa [#allocation3], 1 }
 0x2ed   :  { %266 = vsyncpa [#allocation5], 1 }

</bundles_post_ra>
